<compile_context>
chip_gen: v5e
topology: v5e:2x2
jax: 0.10.0
libtpu: 0.0.40
codegen_flags: <defaults>
</compile_context>

<pallas_src>
import functools

import jax
import jax.numpy as jnp
from jax.experimental import pallas as pl
from jax.experimental.pallas import tpu as pltpu


HIDDENS = [16 * 5 * 5, 200, 200]        # [400, 200, 200]
OUTPUT_DIM = 10
NUM_DISTR = 10

D_IN = HIDDENS[0]                       # 400 (kept unpadded)
H_PAD = 256                             # hidden width 200 -> 256
HEAD_PAD = 256                          # output slab width (two 128-lane halves)
HALF = 128

# lane layout of the fused head / output slab
_PI_LO, _PI_HI = 0, NUM_DISTR                                   # [0, 10)
_MU_LO, _MU_HI = NUM_DISTR, NUM_DISTR + NUM_DISTR * OUTPUT_DIM  # [10, 110)
_SG_LO, _SG_HI = HALF, HALF + NUM_DISTR * OUTPUT_DIM            # [128, 228)


def _round_up(n, m):
    return ((n + m - 1) // m) * m


def _sub_module_kernel(x_ref, w1_ref, w2_ref, wh_ref, b_ref, out_ref):
    # ---- MLP trunk: bf16 MXU operands, f32 accumulation, f32 elementwise ----
    x = x_ref[...]
    if x.dtype != jnp.bfloat16:          # no cast emitted when producer is bf16
        x = x.astype(jnp.bfloat16)

    h1 = jnp.dot(x, w1_ref[...], preferred_element_type=jnp.float32) + b_ref[0:1, :]
    h1 = jnp.maximum(h1, 0.0)                                    # .clamp(min=0)
    h2 = jnp.dot(h1.astype(jnp.bfloat16), w2_ref[...],
                 preferred_element_type=jnp.float32) + b_ref[1:2, :]
    h2 = jnp.maximum(h2, 0.0)                                    # .clamp(min=0)

    # ---- fused density-estimator head: one [256,256] matmul ----
    head = jnp.dot(h2.astype(jnp.bfloat16), wh_ref[...],
                   preferred_element_type=jnp.float32) + b_ref[2:3, :]

    left = head[:, 0:HALF]        # [pi logits | mu | pad]     (aligned 128 lanes)
    right = head[:, HALF:]        # [sigma pre-activations | pad]

    lane = jax.lax.broadcasted_iota(jnp.int32, left.shape, dimension=1)
    is_pi = lane < NUM_DISTR

    # softmax over the first NUM_DISTR lanes only (mixture weights)
    masked = jnp.where(is_pi, left, -jnp.inf)
    m = jnp.max(masked, axis=-1, keepdims=True)
    e = jnp.exp(masked - m)                       # exactly 0 on non-pi lanes
    denom = jnp.sum(e, axis=-1, keepdims=True)
    pi = e * (1.0 / denom)                        # exact per-row reciprocal

    # two aligned, lane-dense 128-wide stores
    out_ref[:, 0:HALF] = jnp.where(is_pi, pi, left)   # [pi | mu | pad]
    out_ref[:, HALF:] = jnp.exp(right)                # [sigma | pad]


def sub_module_forward(x, params, block_b=512):
    """x: [B, 400] float32 (or bfloat16).
    Returns (pi [B,10], mu [B,10,10], sigma [B,10,10])."""
    B = x.shape[0]

    # Balanced batch tiles (avoids near-2x padding for awkward B); at least 2
    # grid steps for large B so the "parallel" axis uses both TCs on v7x.
    n_tiles = max(1, -(-B // block_b))
    if B >= 256:
        n_tiles = max(n_tiles, 2)
    TB = _round_up(-(-B // n_tiles), 8)
    B_pad = _round_up(B, TB)
    if B_pad != B:
        x = jnp.pad(x, ((0, B_pad - B), (0, 0)))

    out = pl.pallas_call(
        _sub_module_kernel,
        out_shape=jax.ShapeDtypeStruct((B_pad, HEAD_PAD), jnp.float32),
        grid=(B_pad // TB,),
        in_specs=[
            pl.BlockSpec((TB, D_IN), lambda i: (i, 0)),       # activations stream
            pl.BlockSpec((D_IN, H_PAD), lambda i: (0, 0)),    # weights stay resident
            pl.BlockSpec((H_PAD, H_PAD), lambda i: (0, 0)),
            pl.BlockSpec((H_PAD, HEAD_PAD), lambda i: (0, 0)),
            pl.BlockSpec((8, HEAD_PAD), lambda i: (0, 0)),    # packed biases
        ],
        out_specs=pl.BlockSpec((TB, HEAD_PAD), lambda i: (i, 0)),
        compiler_params=pltpu.CompilerParams(
            dimension_semantics=("parallel",)),
    )(x, params["w1"], params["w2"], params["wh"], params["b"])

    pi = out[:B, _PI_LO:_PI_HI]
    mu = out[:B, _MU_LO:_MU_HI].reshape(B, NUM_DISTR, OUTPUT_DIM)
    sigma = out[:B, _SG_LO:_SG_HI].reshape(B, NUM_DISTR, OUTPUT_DIM)
    return pi, mu, sigma


def init_params(key):
    """PyTorch-style init U(-1/sqrt(fan_in), 1/sqrt(fan_in)); weights [in, out]."""
    def linear(key, fan_in, fan_out):
        kw, kb = jax.random.split(key)
        bound = 1.0 / jnp.sqrt(fan_in)
        w = jax.random.uniform(kw, (fan_in, fan_out), jnp.float32, -bound, bound)
        b = jax.random.uniform(kb, (1, fan_out), jnp.float32, -bound, bound)
        return w, b

    keys = jax.random.split(key, 5)
    w1, b1 = linear(keys[0], HIDDENS[0], HIDDENS[1])
    w2, b2 = linear(keys[1], HIDDENS[1], HIDDENS[2])
    wpi, bpi = linear(keys[2], HIDDENS[2], NUM_DISTR)
    wmu, bmu = linear(keys[3], HIDDENS[2], NUM_DISTR * OUTPUT_DIM)
    wsg, bsg = linear(keys[4], HIDDENS[2], NUM_DISTR * OUTPUT_DIM)
    return dict(w1=w1, b1=b1, w2=w2, b2=b2,
                wpi=wpi, bpi=bpi, wmu=wmu, bmu=bmu, wsg=wsg, bsg=bsg)


def pack_params(p):
    """Pad hidden dims to 256, fuse the head in two 128-lane halves, cast to bf16."""
    def pad_cols(a, cols):
        return jnp.pad(a, ((0, 0), (0, cols - a.shape[1])))

    w1 = pad_cols(p["w1"], H_PAD).astype(jnp.bfloat16)               # [400, 256]
    w2 = jnp.pad(p["w2"], ((0, H_PAD - p["w2"].shape[0]),
                           (0, H_PAD - p["w2"].shape[1]))).astype(jnp.bfloat16)

    left_w = pad_cols(jnp.concatenate([p["wpi"], p["wmu"]], axis=1), HALF)   # [200,128]
    right_w = pad_cols(p["wsg"], HALF)                                        # [200,128]
    wh = jnp.pad(jnp.concatenate([left_w, right_w], axis=1),
                 ((0, H_PAD - HIDDENS[2]), (0, 0))).astype(jnp.bfloat16)      # [256,256]

    left_b = pad_cols(jnp.concatenate([p["bpi"], p["bmu"]], axis=1), HALF)
    right_b = pad_cols(p["bsg"], HALF)
    bh = jnp.concatenate([left_b, right_b], axis=1)                  # [1, 256]

    b_pack = jnp.zeros((8, HEAD_PAD), jnp.float32)
    b_pack = b_pack.at[0:1, :HIDDENS[1]].set(p["b1"])
    b_pack = b_pack.at[1:2, :HIDDENS[2]].set(p["b2"])
    b_pack = b_pack.at[2:3, :].set(bh)
    return dict(w1=w1, w2=w2, wh=wh, b=b_pack)


def _reference(x, p):
    """Pure-JAX reference mirroring the kernel's bf16-operand / f32-acc matmuls."""
    def mm(a, w):
        return jnp.dot(a.astype(jnp.bfloat16), w.astype(jnp.bfloat16),
                       preferred_element_type=jnp.float32)

    h1 = jnp.maximum(mm(x, p["w1"]) + p["b1"], 0.0)
    h2 = jnp.maximum(mm(h1, p["w2"]) + p["b2"], 0.0)
    pi = jax.nn.softmax(mm(h2, p["wpi"]) + p["bpi"], axis=-1)
    mu = (mm(h2, p["wmu"]) + p["bmu"]).reshape(x.shape[0], NUM_DISTR, OUTPUT_DIM)
    sg = jnp.exp(mm(h2, p["wsg"]) + p["bsg"]).reshape(x.shape[0], NUM_DISTR, OUTPUT_DIM)
    return pi, mu, sg


if __name__ == "__main__":
    key = jax.random.PRNGKey(0)
    kx, kp = jax.random.split(key)

    B = 8
    x = jax.random.normal(kx, (B, HIDDENS[0]), jnp.float32)   # [8, 400]
    params = init_params(kp)
    kparams = pack_params(params)

    fwd = jax.jit(functools.partial(sub_module_forward, params=kparams))
    pi, mu, sigma = fwd(x)
    jax.block_until_ready((pi, mu, sigma))

    # sanity check against a pure-JAX reference (same bf16 matmul operands)
    pi_r, mu_r, sg_r = _reference(x, params)
    assert jnp.allclose(pi, pi_r, atol=5e-3, rtol=5e-3), "pi mismatch"
    assert jnp.allclose(mu, mu_r, atol=5e-3, rtol=5e-3), "mu mismatch"
    assert jnp.allclose(sigma, sg_r, atol=1e-2, rtol=1e-2), "sigma mismatch"
    assert jnp.allclose(jnp.sum(pi, axis=-1), 1.0, atol=1e-3), "pi not normalized"

    print("KERNEL_OK")
</pallas_src>

<mosaic_0001>
module attributes {stable_mosaic.version = 11 : i64} {
  func.func @_sub_module_kernel(%arg0: i32, %arg1: memref<8x400xf32, #tpu.memory_space<vmem>>, %arg2: memref<400x256xbf16, #tpu.memory_space<vmem>>, %arg3: memref<256x256xbf16, #tpu.memory_space<vmem>>, %arg4: memref<256x256xbf16, #tpu.memory_space<vmem>>, %arg5: memref<8x256xf32, #tpu.memory_space<vmem>>, %arg6: memref<8x256xf32, #tpu.memory_space<vmem>>) attributes {dimension_semantics = [#tpu.dimension_semantics<parallel>], iteration_bounds = array<i64: 1>, scalar_prefetch = 0 : i64, scratch_operands = 0 : i64, tpu.core_type = #tpu.core_type<tc>, window_params = [{transform_indices = @transform_0, window_bounds = array<i64: 8, 400>}, {pipeline_mode = #tpu.pipeline_mode<synchronous>, transform_indices = @transform_1, window_bounds = array<i64: 400, 256>}, {pipeline_mode = #tpu.pipeline_mode<synchronous>, transform_indices = @transform_2, window_bounds = array<i64: 256, 256>}, {pipeline_mode = #tpu.pipeline_mode<synchronous>, transform_indices = @transform_3, window_bounds = array<i64: 256, 256>}, {pipeline_mode = #tpu.pipeline_mode<synchronous>, transform_indices = @transform_4, window_bounds = array<i64: 8, 256>}, {transform_indices = @transform_5, window_bounds = array<i64: 8, 256>}]} {
    %c0 = arith.constant 0 : index
    %c0_0 = arith.constant 0 : index
    %0 = vector.load %arg1[%c0, %c0_0] : memref<8x400xf32, #tpu.memory_space<vmem>>, vector<8x400xf32>
    %1 = arith.truncf %0 : vector<8x400xf32> to vector<8x400xbf16>
    %c0_1 = arith.constant 0 : index
    %c0_2 = arith.constant 0 : index
    %2 = vector.load %arg2[%c0_1, %c0_2] : memref<400x256xbf16, #tpu.memory_space<vmem>>, vector<400x256xbf16>
    %cst = arith.constant dense<0.000000e+00> : vector<8x256xf32>
    %3 = tpu.matmul %1, %2, %cst {dimension_numbers = #tpu.dot_dimension_numbers<[1], [0], [0], [1], [0, 0, 1, 1], [], []>} : vector<8x400xbf16>, vector<400x256xbf16>, vector<8x256xf32> -> vector<8x256xf32>
    %c0_3 = arith.constant 0 : index
    %c0_4 = arith.constant 0 : index
    %4 = vector.load %arg5[%c0_3, %c0_4] : memref<8x256xf32, #tpu.memory_space<vmem>>, vector<1x256xf32>
    %5 = vector.broadcast %4 : vector<1x256xf32> to vector<8x256xf32>
    %6 = arith.addf %3, %5 : vector<8x256xf32>
    %cst_5 = arith.constant 0.000000e+00 : f32
    %7 = vector.broadcast %cst_5 : f32 to vector<8x256xf32>
    %8 = arith.maximumf %6, %7 : vector<8x256xf32>
    %9 = arith.truncf %8 : vector<8x256xf32> to vector<8x256xbf16>
    %c0_6 = arith.constant 0 : index
    %c0_7 = arith.constant 0 : index
    %10 = vector.load %arg3[%c0_6, %c0_7] : memref<256x256xbf16, #tpu.memory_space<vmem>>, vector<256x256xbf16>
    %cst_8 = arith.constant dense<0.000000e+00> : vector<8x256xf32>
    %11 = tpu.matmul %9, %10, %cst_8 {dimension_numbers = #tpu.dot_dimension_numbers<[1], [0], [0], [1], [0, 0, 1, 1], [], []>} : vector<8x256xbf16>, vector<256x256xbf16>, vector<8x256xf32> -> vector<8x256xf32>
    %c1 = arith.constant 1 : index
    %c0_9 = arith.constant 0 : index
    %12 = vector.load %arg5[%c1, %c0_9] : memref<8x256xf32, #tpu.memory_space<vmem>>, vector<1x256xf32>
    %13 = vector.broadcast %12 : vector<1x256xf32> to vector<8x256xf32>
    %14 = arith.addf %11, %13 : vector<8x256xf32>
    %cst_10 = arith.constant 0.000000e+00 : f32
    %15 = vector.broadcast %cst_10 : f32 to vector<8x256xf32>
    %16 = arith.maximumf %14, %15 : vector<8x256xf32>
    %17 = arith.truncf %16 : vector<8x256xf32> to vector<8x256xbf16>
    %c0_11 = arith.constant 0 : index
    %c0_12 = arith.constant 0 : index
    %18 = vector.load %arg4[%c0_11, %c0_12] : memref<256x256xbf16, #tpu.memory_space<vmem>>, vector<256x256xbf16>
    %cst_13 = arith.constant dense<0.000000e+00> : vector<8x256xf32>
    %19 = tpu.matmul %17, %18, %cst_13 {dimension_numbers = #tpu.dot_dimension_numbers<[1], [0], [0], [1], [0, 0, 1, 1], [], []>} : vector<8x256xbf16>, vector<256x256xbf16>, vector<8x256xf32> -> vector<8x256xf32>
    %c2 = arith.constant 2 : index
    %c0_14 = arith.constant 0 : index
    %20 = vector.load %arg5[%c2, %c0_14] : memref<8x256xf32, #tpu.memory_space<vmem>>, vector<1x256xf32>
    %21 = vector.broadcast %20 : vector<1x256xf32> to vector<8x256xf32>
    %22 = arith.addf %19, %21 : vector<8x256xf32>
    %23 = vector.extract_strided_slice %22 {offsets = [0, 0], sizes = [8, 128], strides = [1, 1]} : vector<8x256xf32> to vector<8x128xf32>
    %24 = vector.extract_strided_slice %22 {offsets = [0, 128], sizes = [8, 128], strides = [1, 1]} : vector<8x256xf32> to vector<8x128xf32>
    %25 = tpu.iota {dimensions = array<i32: 1>} : vector<8x128xi32>
    %c10_i32 = arith.constant 10 : i32
    %26 = vector.broadcast %c10_i32 : i32 to vector<8x128xi32>
    %27 = arith.cmpi slt, %25, %26 : vector<8x128xi32>
    %cst_15 = arith.constant 0xFF800000 : f32
    %28 = vector.broadcast %cst_15 : f32 to vector<8x128xf32>
    %29 = arith.select %27, %23, %28 : vector<8x128xi1>, vector<8x128xf32>
    %cst_16 = arith.constant dense<0xFF800000> : vector<8xf32>
    %30 = vector.multi_reduction <maximumf>, %29, %cst_16 [1] : vector<8x128xf32> to vector<8xf32>
    %31 = vector.shape_cast %30 : vector<8xf32> to vector<8x1xf32>
    %32 = vector.broadcast %31 : vector<8x1xf32> to vector<8x128xf32>
    %33 = arith.subf %29, %32 : vector<8x128xf32>
    %34 = math.exp %33 : vector<8x128xf32>
    %cst_17 = arith.constant dense<0.000000e+00> : vector<8xf32>
    %35 = vector.multi_reduction <add>, %34, %cst_17 [1] : vector<8x128xf32> to vector<8xf32>
    %36 = vector.shape_cast %35 : vector<8xf32> to vector<8x1xf32>
    %cst_18 = arith.constant 1.000000e+00 : f32
    %37 = vector.broadcast %cst_18 : f32 to vector<8x1xf32>
    %38 = arith.divf %37, %36 : vector<8x1xf32>
    %39 = vector.broadcast %38 : vector<8x1xf32> to vector<8x128xf32>
    %40 = arith.mulf %34, %39 : vector<8x128xf32>
    %41 = arith.select %27, %40, %23 : vector<8x128xi1>, vector<8x128xf32>
    %c0_19 = arith.constant 0 : index
    %c0_20 = arith.constant 0 : index
    %42 = vector.load %arg6[%c0_19, %c0_20] : memref<8x256xf32, #tpu.memory_space<vmem>>, vector<8x128xf32>
    tpu.vector_store %arg6[%c0_19, %c0_20], %41 {strides = array<i32>} : memref<8x256xf32, #tpu.memory_space<vmem>>, vector<8x128xf32>,
    %43 = math.exp %24 : vector<8x128xf32>
    %c0_21 = arith.constant 0 : index
    %c128 = arith.constant 128 : index
    %44 = vector.load %arg6[%c0_21, %c128] : memref<8x256xf32, #tpu.memory_space<vmem>>, vector<8x128xf32>
    tpu.vector_store %arg6[%c0_21, %c128], %43 {strides = array<i32>} : memref<8x256xf32, #tpu.memory_space<vmem>>, vector<8x128xf32>,
    return
  }
  func.func @transform_0(%arg0: i32) -> (i32, i32) {
    %c0_i32 = arith.constant 0 : i32
    %c0_i32_0 = arith.constant 0 : i32
    return %arg0, %c0_i32 : i32, i32
  }
  func.func @transform_1(%arg0: i32) -> (i32, i32) {
    %c0_i32 = arith.constant 0 : i32
    %c0_i32_0 = arith.constant 0 : i32
    %c0_i32_1 = arith.constant 0 : i32
    return %c0_i32, %c0_i32_0 : i32, i32
  }
  func.func @transform_2(%arg0: i32) -> (i32, i32) {
    %c0_i32 = arith.constant 0 : i32
    %c0_i32_0 = arith.constant 0 : i32
    %c0_i32_1 = arith.constant 0 : i32
    return %c0_i32, %c0_i32_0 : i32, i32
  }
  func.func @transform_3(%arg0: i32) -> (i32, i32) {
    %c0_i32 = arith.constant 0 : i32
    %c0_i32_0 = arith.constant 0 : i32
    %c0_i32_1 = arith.constant 0 : i32
    return %c0_i32, %c0_i32_0 : i32, i32
  }
  func.func @transform_4(%arg0: i32) -> (i32, i32) {
    %c0_i32 = arith.constant 0 : i32
    %c0_i32_0 = arith.constant 0 : i32
    %c0_i32_1 = arith.constant 0 : i32
    return %c0_i32, %c0_i32_0 : i32, i32
  }
  func.func @transform_5(%arg0: i32) -> (i32, i32) {
    %c0_i32 = arith.constant 0 : i32
    %c0_i32_0 = arith.constant 0 : i32
    return %arg0, %c0_i32 : i32, i32
  }
}

</mosaic_0001>

<bundles_post_ra>
// kernel: sub_module_forward.1
= control target key start
LH: loop header
LB: loop body
LE: loop exit
PB: predicated region body
PF: predicated region fallthrough
CT: control target
= control target key end

     0   :  { %10 = vsyncpa [#allocation3], 0  ;;  %s1851_s0 = inlined_call_operand.hbm [shape: f32[8,400], index: 0, kind: input, shape index: {}]   ;;  %s1852_s1 = inlined_call_operand.hbm [shape: bf16[400,256], index: 1, kind: input, shape index: {}]   ;;  %s1853_s2 = inlined_call_operand.hbm [shape: bf16[256,256], index: 2, kind: input, shape index: {}]   ;;  %s1854_s3 = inlined_call_operand.hbm [shape: bf16[256,256], index: 3, kind: input, shape index: {}]   ;;  %s1855_s4 = inlined_call_operand.hbm [shape: f32[8,256], index: 4, kind: input, shape index: {}]   ;;  %s1856_s5 = inlined_call_operand.vmem [shape: f32[8,256], index: 5, kind: output, shape index: {}]  }
   0x1   :  { %11 = vsyncpa [#allocation5], 0  ;;  %s28_s20 = sshll.u32 %s1852_s1, 4  ;;  %s29_s20 = int_to_ptr.hbm [resolvable:$true] %s28_s20 }
   0x2   :  { %12 = vsyncpa [#allocation8], 0  ;;  %s1777_s21 = smov [#allocation4]   ;;  %s54_s25 = sshll.u32 %s1854_s3, 4  ;;  %s55_s25 = int_to_ptr.hbm [resolvable:$true] %s54_s25 }
   0x3   :  { %s30_s22 = sshll.u32 %s1777_s21, 4  ;;  %s1778_s26 = smov 128   ;;  %s31_s22 = int_to_ptr.vmem [resolvable:$true] %s30_s22 }
   0x4   :  { %s1779_s27 = smov 8   ;;  %s1780_s28 = smov [#allocation7]  }
   0x5   :  { %36 = dma.hbm_to_vmem [thread:$0]  %s29_s20, 6400, %s31_s22, [#allocation5], %s1778_s26, %s1778_s26, %s1779_s27  }
   0x6   :  { %s56_s29 = sshll.u32 %s1780_s28, 4  ;;  %s18_s7 = sshll.u32 %s1851_s0, 4  ;;  %s57_s29 = int_to_ptr.vmem [resolvable:$true] %s56_s29  ;;  %s19_s7 = int_to_ptr.hbm [resolvable:$true] %s18_s7 }
   0x7   :  { %62 = dma.hbm_to_vmem [thread:$0]  %s55_s25, 4096, %s57_s29, [#allocation8], %s1778_s26, %s1778_s26, %s1779_s27  }
   0x8   :  { %s41_s9 = sshll.u32 %s1853_s2, 4  ;;  %s1781_s10 = smov [#allocation2]   ;;  %s42_s9 = int_to_ptr.hbm [resolvable:$true] %s41_s9 }
   0x9   :  { %s20_s11 = sshll.u32 %s1781_s10, 4  ;;  %s1782_s3 = smov [#allocation6]   ;;  %s21_s11 = int_to_ptr.vmem [resolvable:$true] %s20_s11 }
   0xa   :  { %23 = dma.hbm_to_vmem [thread:$0]  %s19_s7, 512, %s21_s11, [#allocation3]  }
   0xb   :  { %s43_s12 = sshll.u32 %s1782_s3, 4  ;;  %s68_s15 = sshll.u32 %s1855_s4, 4  ;;  %s44_s12 = int_to_ptr.vmem [resolvable:$true] %s43_s12  ;;  %s69_s15 = int_to_ptr.hbm [resolvable:$true] %s68_s15 }
   0xc   :  { %49 = dma.hbm_to_vmem [thread:$0]  %s42_s9, 4096, %s44_s12, [#allocation5], %s1778_s26, %s1778_s26, %s1779_s27  }
   0xd   :  { %s1783_s0 = smov [#allocation9]  }
   0xe   :  { %s70_s16 = sshll.u32 %s1783_s0, 4  ;;  %s71_s16 = int_to_ptr.vmem [resolvable:$true] %s70_s16 }
   0xf   :  { %73 = dma.hbm_to_vmem [thread:$0]  %s69_s15, 256, %s71_s16, [#allocation8]  }
  0x10   :  { %1771 = dma.done.wait [#allocation3], 512  }
  0x11   :  { %1772 = vsyncadd [#allocation3], 4294966784 }
  0x12   :  { %1773 = dma.done.wait [#allocation5], 10496  }
  0x13   :  { %1774 = vsyncadd [#allocation5], 4294956800 }
  0x14   :  { %1775 = dma.done.wait [#allocation8], 4352  }
  0x15   :  { %1776 = vsyncadd [#allocation8], 4294962944  ;;  %v1124_v0 = vld [vmem:[#allocation4 + $0x70] sm:$0xf]  ;;  %v1539_v1 = vld [vmem:[#allocation4 + $0x74] sm:$0xf0] }
  0x16   :  { %v1188_v2 = vld [vmem:[#allocation4 + $0xf0] sm:$0xf]  ;;  %v1125_v3 = vor.u32 %v1539_v1, %v1124_v0  ;;  %v1555_v4 = vld [vmem:[#allocation4 + $0xf4] sm:$0xf0]  ;;  %v1116_v9 = vld [vmem:[#allocation4 + $0x60] sm:$0xf] }
  0x17   :  { %v1252_v5 = vld [vmem:[#allocation4 + $0x170] sm:$0xf]  ;;  %v1571_v6 = vld [vmem:[#allocation4 + $0x174] sm:$0xf0]  ;;  %v1189_v7 = vor.u32 %v1555_v4, %v1188_v2  ;;  %v1537_v10 = vld [vmem:[#allocation4 + $0x64] sm:$0xf0] }
  0x18   :  { %v1253_v8 = vor.u32 %v1571_v6, %v1252_v5  ;;  %v1180_v11 = vld [vmem:[#allocation4 + $0xe0] sm:$0xf]  ;;  %413 = vmatpush.bf16.msra.mxu0 %v1125_v3  ;;  %v1117_v12 = vor.u32 %v1537_v10, %v1116_v9  ;;  %v1553_v13 = vld [vmem:[#allocation4 + $0xe4] sm:$0xf0]  ;;  %v1108_v18 = vld [vmem:[#allocation4 + $0x50] sm:$0xf] }
  0x19   :  { %v1244_v14 = vld [vmem:[#allocation4 + $0x160] sm:$0xf]  ;;  %v1569_v15 = vld [vmem:[#allocation4 + $0x164] sm:$0xf0]  ;;  %426 = vmatpush.bf16.msra.mxu1 %v1189_v7  ;;  %v1181_v16 = vor.u32 %v1553_v13, %v1180_v11  ;;  %v1535_v19 = vld [vmem:[#allocation4 + $0x54] sm:$0xf0] }
  0x1a   :  { %439 = vmatpush.bf16.msra.mxu2 %v1253_v8  ;;  %v1245_v17 = vor.u32 %v1569_v15, %v1244_v14  ;;  %v1172_v20 = vld [vmem:[#allocation4 + $0xd0] sm:$0xf]  ;;  %v1551_v21 = vld [vmem:[#allocation4 + $0xd4] sm:$0xf0]  ;;  %v1100_v24 = vld [vmem:[#allocation4 + $0x40] sm:$0xf]  ;;  %v1109_v25 = vor.u32 %v1535_v19, %v1108_v18 }
  0x1b   :  { %v1236_v22 = vld [vmem:[#allocation4 + $0x150] sm:$0xf]  ;;  %v1567_v23 = vld [vmem:[#allocation4 + $0x154] sm:$0xf0]  ;;  %v1533_v26 = vld [vmem:[#allocation4 + $0x44] sm:$0xf0]  ;;  %v1173_v29 = vor.u32 %v1551_v21, %v1172_v20 }
  0x1c   :  { %414 = vmatpush.bf16.msra.mxu0 %v1117_v12  ;;  %v1164_v27 = vld [vmem:[#allocation4 + $0xc0] sm:$0xf]  ;;  %v1549_v28 = vld [vmem:[#allocation4 + $0xc4] sm:$0xf0]  ;;  %v1237_v30 = vor.u32 %v1567_v23, %v1236_v22  ;;  %v1538_v33 = vld [vmem:[#allocation4 + $0x74] sm:$0xf]  ;;  %v1101_v39 = vor.u32 %v1533_v26, %v1100_v24 }
  0x1d   :  { %427 = vmatpush.bf16.msra.mxu1 %v1181_v16  ;;  %v1260_v31 = vld [vmem:[#allocation4 + $0x180] sm:$0xf]  ;;  %v1573_v32 = vld [vmem:[#allocation4 + $0x184] sm:$0xf0]  ;;  %v1126_v37 = vld [vmem:[#allocation4 + $0x78] sm:$0xf0]  ;;  %v1165_v42 = vor.u32 %v1549_v28, %v1164_v27 }
  0x1e   :  { %440 = vmatpush.bf16.msra.mxu2 %v1245_v17  ;;  %v1228_v34 = vld [vmem:[#allocation4 + $0x140] sm:$0xf]  ;;  %v1565_v35 = vld [vmem:[#allocation4 + $0x144] sm:$0xf0]  ;;  %v1261_v36 = vor.u32 %v1573_v32, %v1260_v31  ;;  %v1129_v38 = vor.u32 %v1538_v33, %v1126_v37  ;;  %v1536_v40 = vld [vmem:[#allocation4 + $0x64] sm:$0xf] }
  0x1f   :  { %v1118_v41 = vld [vmem:[#allocation4 + $0x68] sm:$0xf0]  ;;  %v1229_v43 = vor.u32 %v1565_v35, %v1228_v34  ;;  %v1092_v44 = vld [vmem:[#allocation4 + $0x30] sm:$0xf]  ;;  %v1531_v45 = vld [vmem:[#allocation4 + $0x34] sm:$0xf0] }
  0x20   :  { %415 = vmatpush.bf16.msra.mxu0 %v1109_v25  ;;  %459 = vmatpush.bf16.msra.mxu3 %v1261_v36  ;;  %v1156_v46 = vld [vmem:[#allocation4 + $0xb0] sm:$0xf]  ;;  %v1547_v47 = vld [vmem:[#allocation4 + $0xb4] sm:$0xf0]  ;;  %v1121_v50 = vor.u32 %v1536_v40, %v1118_v41  ;;  %v1534_v51 = vld [vmem:[#allocation4 + $0x54] sm:$0xf]  ;;  %v1093_v53 = vor.u32 %v1531_v45, %v1092_v44 }
  0x21   :  { %428 = vmatpush.bf16.msra.mxu1 %v1173_v29  ;;  %v1220_v48 = vld [vmem:[#allocation4 + $0x130] sm:$0xf]  ;;  %v1563_v49 = vld [vmem:[#allocation4 + $0x134] sm:$0xf0]  ;;  %v1110_v52 = vld [vmem:[#allocation4 + $0x58] sm:$0xf0]  ;;  %v1157_v54 = vor.u32 %v1547_v47, %v1156_v46 }
  0x22   :  { %441 = vmatpush.bf16.msra.mxu2 %v1237_v30  ;;  %v1221_v55 = vor.u32 %v1563_v49, %v1220_v48  ;;  %v1084_v56 = vld [vmem:[#allocation4 + $0x20] sm:$0xf]  ;;  %v1529_v57 = vld [vmem:[#allocation4 + $0x24] sm:$0xf0]  ;;  %v1113_v62 = vor.u32 %v1534_v51, %v1110_v52  ;;  %v1532_v63 = vld [vmem:[#allocation4 + $0x44] sm:$0xf] }
  0x23   :  { %v1148_v58 = vld [vmem:[#allocation4 + $0xa0] sm:$0xf]  ;;  %v1545_v59 = vld [vmem:[#allocation4 + $0xa4] sm:$0xf0]  ;;  %v1102_v0 = vld [vmem:[#allocation4 + $0x48] sm:$0xf0]  ;;  %v1085_v1 = vor.u32 %v1529_v57, %v1084_v56 }
  0x24   :  { %465 = vmatpush.bf16.msrb.mxu3 %v1129_v38  ;;  %416 = vmatpush.bf16.msra.mxu0 %v1101_v39  ;;  %v1212_v60 = vld [vmem:[#allocation4 + $0x120] sm:$0xf]  ;;  %v1561_v61 = vld [vmem:[#allocation4 + $0x124] sm:$0xf0]  ;;  %v98_v2 = vld [vmem:[#allocation2 + $0x18] sm:$0xff]  ;;  %vm409_vm0 = vcmask 130048   ;;  %v1149_v3 = vor.u32 %v1545_v59, %v1148_v58  ;;  %v1105_v12 = vor.u32 %v1532_v63, %v1102_v0 }
  0x25   :  { %429 = vmatpush.bf16.msra.mxu1 %v1165_v42  ;;  %v1213_v4 = vor.u32 %v1561_v61, %v1212_v60  ;;  %v1076_v5 = vld [vmem:[#allocation4 + $0x10] sm:$0xf]  ;;  %v1527_v6 = vld [vmem:[#allocation4 + $0x14] sm:$0xf0]  ;;  %v1829_v8 = vpack.c.bf16 %v98_v2, %v98_v2  ;;  %v1530_v13 = vld [vmem:[#allocation4 + $0x34] sm:$0xf] }
  0x26   :  { %442 = vmatpush.bf16.msra.mxu2 %v1229_v43  ;;  %v1140_v7 = vld [vmem:[#allocation4 + $0x90] sm:$0xf]  ;;  %v1543_v9 = vld [vmem:[#allocation4 + $0x94] sm:$0xf0]  ;;  %v1094_v14 = vld [vmem:[#allocation4 + $0x38] sm:$0xf0]  ;;  %v1077_v15 = vor.u32 %v1527_v6, %v1076_v5 }
  0x27   :  { %v1204_v10 = vld [vmem:[#allocation4 + $0x110] sm:$0xf]  ;;  %v1559_v11 = vld [vmem:[#allocation4 + $0x114] sm:$0xf0]  ;;  %1266 = vmatmul.msk.bf16.vlgmr.msra.gmra.mxu3 %vm409_vm0, %v1829_v8  ;;  %v1068_v16 = vld [vmem:[#allocation4] sm:$0xf]  ;;  %v1141_v17 = vor.u32 %v1543_v9, %v1140_v7  ;;  %v1097_v24 = vor.u32 %v1530_v13, %v1094_v14 }
  0x28   :  { %466 = vmatpush.bf16.msrb.mxu3 %v1121_v50  ;;  %417 = vmatpush.bf16.msra.mxu0 %v1093_v53  ;;  %v1205_v18 = vor.u32 %v1559_v11, %v1204_v10  ;;  %v1525_v19 = vld [vmem:[#allocation4 + $0x4] sm:$0xf0]  ;;  %v1132_v20 = vld [vmem:[#allocation4 + $0x80] sm:$0xf]  ;;  %v1554_v25 = vld [vmem:[#allocation4 + $0xf4] sm:$0xf] }
  0x29   :  { %430 = vmatpush.bf16.msra.mxu1 %v1157_v54  ;;  %v1541_v21 = vld [vmem:[#allocation4 + $0x84] sm:$0xf0]  ;;  %v1196_v22 = vld [vmem:[#allocation4 + $0x100] sm:$0xf]  ;;  %v1190_v26 = vld [vmem:[#allocation4 + $0xf8] sm:$0xf0]  ;;  %v1069_v29 = vor.u32 %v1525_v19, %v1068_v16 }
  0x2a   :  { %443 = vmatpush.bf16.msra.mxu2 %v1221_v55  ;;  %v1557_v23 = vld [vmem:[#allocation4 + $0x104] sm:$0xf0]  ;;  %v1570_v27 = vld [vmem:[#allocation4 + $0x174] sm:$0xf]  ;;  %v1254_v28 = vld [vmem:[#allocation4 + $0x178] sm:$0xf0]  ;;  %v1133_v33 = vor.u32 %v1541_v21, %v1132_v20  ;;  %v1193_v37 = vor.u32 %v1554_v25, %v1190_v26 }
  0x2b   :  { %v95_v30 = vld [vmem:[#allocation2] sm:$0xff]  ;;  %v1086_v32 = vld [vmem:[#allocation4 + $0x28] sm:$0xf0]  ;;  %v1197_v34 = vor.u32 %v1557_v23, %v1196_v22  ;;  %v97_v35 = vld [vmem:[#allocation2 + $0x10] sm:$0xff]  ;;  %v1257_v38 = vor.u32 %v1570_v27, %v1254_v28 }
  0x2c   :  { %467 = vmatpush.bf16.msrb.mxu3 %v1113_v62  ;;  %418 = vmatpush.bf16.msra.mxu0 %v1085_v1  ;;  %v1528_v31 = vld [vmem:[#allocation4 + $0x24] sm:$0xf]  ;;  %v96_v36 = vld [vmem:[#allocation2 + $0x8] sm:$0xff]  ;;  %v99_v42 = vpack.c.bf16 %v95_v30, %v95_v30  ;;  %v1833_v47 = vpack.c.bf16 %v97_v35, %v97_v35  ;;  %v1526_v49 = vld [vmem:[#allocation4 + $0x14] sm:$0xf] }
  0x2d   :  { %431 = vmatpush.bf16.msra.mxu1 %v1149_v3  ;;  %v1552_v39 = vld [vmem:[#allocation4 + $0xe4] sm:$0xf]  ;;  %v1262_v41 = vld [vmem:[#allocation4 + $0x188] sm:$0xf0]  ;;  %v1089_v43 = vor.u32 %v1528_v31, %v1086_v32  ;;  %v1835_v48 = vpack.c.bf16 %v96_v36, %v96_v36  ;;  %v1078_v50 = vld [vmem:[#allocation4 + $0x18] sm:$0xf0] }
  0x2e   :  { %444 = vmatpush.bf16.msra.mxu2 %v1213_v4  ;;  %v1572_v40 = vld [vmem:[#allocation4 + $0x184] sm:$0xf]  ;;  %v1182_v44 = vld [vmem:[#allocation4 + $0xe8] sm:$0xf0]  ;;  %v1550_v54 = vld [vmem:[#allocation4 + $0xd4] sm:$0xf]  ;;  %v1081_v55 = vor.u32 %v1526_v49, %v1078_v50 }
  0x2f   :  { %v1568_v45 = vld [vmem:[#allocation4 + $0x164] sm:$0xf]  ;;  %v1246_v46 = vld [vmem:[#allocation4 + $0x168] sm:$0xf0]  ;;  %v1265_v51 = vor.u32 %v1572_v40, %v1262_v41  ;;  %v1185_v52 = vor.u32 %v1552_v39, %v1182_v44  ;;  %v1174_v56 = vld [vmem:[#allocation4 + $0xd8] sm:$0xf0] }
  0x30   :  { %468 = vmatpush.bf16.msrb.mxu3 %v1105_v12  ;;  %419 = vmatpush.bf16.msra.mxu0 %v1077_v15  ;;  %v1249_v53 = vor.u32 %v1568_v45, %v1246_v46  ;;  %v1566_v57 = vld [vmem:[#allocation4 + $0x154] sm:$0xf]  ;;  %v1238_v58 = vld [vmem:[#allocation4 + $0x158] sm:$0xf0]  ;;  %v1524_v59 = vld [vmem:[#allocation4 + $0x4] sm:$0xf]  ;;  %v1177_v63 = vor.u32 %v1550_v54, %v1174_v56 }
  0x31   :  { %432 = vmatpush.bf16.msra.mxu1 %v1141_v17  ;;  %v1070_v60 = vld [vmem:[#allocation4 + $0x8] sm:$0xf0]  ;;  %v1326_v61 = vld [vmem:[#allocation6 + $0x70] sm:$0xf]  ;;  %v1589_v62 = vld [vmem:[#allocation6 + $0x74] sm:$0xf0]  ;;  %v1241_v0 = vor.u32 %v1566_v57, %v1238_v58 }
  0x32   :  { %445 = vmatpush.bf16.msra.mxu2 %v1205_v18  ;;  %v1548_v1 = vld [vmem:[#allocation4 + $0xc4] sm:$0xf]  ;;  %v1073_v2 = vor.u32 %v1524_v59, %v1070_v60  ;;  %v1166_v3 = vld [vmem:[#allocation4 + $0xc8] sm:$0xf0]  ;;  %v1327_v6 = vor.u32 %v1589_v62, %v1326_v61  ;;  %v1318_v7 = vld [vmem:[#allocation6 + $0x60] sm:$0xf] }
  0x33   :  { %v1564_v4 = vld [vmem:[#allocation4 + $0x144] sm:$0xf]  ;;  %v1230_v5 = vld [vmem:[#allocation4 + $0x148] sm:$0xf0]  ;;  %v1587_v9 = vld [vmem:[#allocation6 + $0x64] sm:$0xf0]  ;;  %v1169_v10 = vor.u32 %v1548_v1, %v1166_v3 }
  0x34   :  { %469 = vmatpush.bf16.msrb.mxu3 %v1097_v24  ;;  %420 = vmatpush.bf16.msra.mxu0 %v1069_v29  ;;  %v1233_v11 = vor.u32 %v1564_v4, %v1230_v5  ;;  %v1546_v12 = vld [vmem:[#allocation4 + $0xb4] sm:$0xf]  ;;  %v1158_v13 = vld [vmem:[#allocation4 + $0xb8] sm:$0xf0]  ;;  %v1319_v16 = vor.u32 %v1587_v9, %v1318_v7  ;;  %v1310_v17 = vld [vmem:[#allocation6 + $0x50] sm:$0xf] }
  0x35   :  { %433 = vmatpush.bf16.msra.mxu1 %v1133_v33  ;;  %v1562_v14 = vld [vmem:[#allocation4 + $0x134] sm:$0xf]  ;;  %v1222_v15 = vld [vmem:[#allocation4 + $0x138] sm:$0xf0]  ;;  %v1585_v18 = vld [vmem:[#allocation6 + $0x54] sm:$0xf0]  ;;  %v1161_v19 = vor.u32 %v1546_v12, %v1158_v13 }
  0x36   :  { %446 = vmatpush.bf16.msra.mxu2 %v1197_v34  ;;  %v1225_v20 = vor.u32 %v1562_v14, %v1222_v15  ;;  %v1544_v21 = vld [vmem:[#allocation4 + $0xa4] sm:$0xf]  ;;  %v1150_v22 = vld [vmem:[#allocation4 + $0xa8] sm:$0xf0]  ;;  %v1311_v25 = vor.u32 %v1585_v18, %v1310_v17  ;;  %v1302_v26 = vld [vmem:[#allocation6 + $0x40] sm:$0xf] }
  0x37   :  { %421 = vmatmul.bf16.vlgmr.msra.gmra.mxu0 %v99_v42  ;;  %v1560_v23 = vld [vmem:[#allocation4 + $0x124] sm:$0xf]  ;;  %v1214_v24 = vld [vmem:[#allocation4 + $0x128] sm:$0xf0]  ;;  %v1583_v27 = vld [vmem:[#allocation6 + $0x44] sm:$0xf0]  ;;  %v1153_v28 = vor.u32 %v1544_v21, %v1150_v22 }
  0x38   :  { %478 = vmatpush.bf16.msrb.mxu0 %v1193_v37  ;;  %470 = vmatpush.bf16.msrb.mxu3 %v1089_v43  ;;  %v1217_v29 = vor.u32 %v1560_v23, %v1214_v24  ;;  %v1542_v30 = vld [vmem:[#allocation4 + $0x94] sm:$0xf]  ;;  %v1142_v31 = vld [vmem:[#allocation4 + $0x98] sm:$0xf0]  ;;  %v1303_v34 = vor.u32 %v1583_v27, %v1302_v26  ;;  %v1294_v35 = vld [vmem:[#allocation6 + $0x30] sm:$0xf] }
  0x39   :  { %491 = vmatpush.bf16.msrb.mxu1 %v1257_v38  ;;  %447 = vmatmul.bf16.vlgmr.msra.gmra.mxu2 %v1833_v47  ;;  %v1558_v32 = vld [vmem:[#allocation4 + $0x114] sm:$0xf]  ;;  %v1206_v33 = vld [vmem:[#allocation4 + $0x118] sm:$0xf0]  ;;  %v1581_v36 = vld [vmem:[#allocation6 + $0x34] sm:$0xf0]  ;;  %v1145_v37 = vor.u32 %v1542_v30, %v1142_v31 }
  0x3a   :  { %434 = vmatmul.bf16.vlgmr.msra.gmra.mxu1 %v1835_v48  ;;  %511 = vmatpush.bf16.msrb.mxu2 %v1265_v51  ;;  %v1209_v38 = vor.u32 %v1558_v32, %v1206_v33  ;;  %v1540_v39 = vld [vmem:[#allocation4 + $0x84] sm:$0xf]  ;;  %v1134_v40 = vld [vmem:[#allocation4 + $0x88] sm:$0xf0]  ;;  %v1295_v45 = vor.u32 %v1581_v36, %v1294_v35  ;;  %v1586_v50 = vld [vmem:[#allocation6 + $0x64] sm:$0xf] }
  0x3b   :  { %v1556_v41 = vld [vmem:[#allocation4 + $0x104] sm:$0xf]  ;;  %v1328_v44 = vld [vmem:[#allocation6 + $0x78] sm:$0xf0]  ;;  %v1137_v46 = vor.u32 %v1540_v39, %v1134_v40  ;;  %v1320_v51 = vld [vmem:[#allocation6 + $0x68] sm:$0xf0] }
  0x3c   :  { %479 = vmatpush.bf16.msrb.mxu0 %v1185_v52  ;;  %471 = vmatpush.bf16.msrb.mxu3 %v1081_v55  ;;  %v1588_v43 = vld [vmem:[#allocation6 + $0x74] sm:$0xf]  ;;  %v1323_v52 = vor.u32 %v1586_v50, %v1320_v51  ;;  %v1312_v54 = vld [vmem:[#allocation6 + $0x58] sm:$0xf0]  ;;  %v1582_v56 = vld [vmem:[#allocation6 + $0x44] sm:$0xf] }
  0x3d   :  { %492 = vmatpush.bf16.msrb.mxu1 %v1249_v53  ;;  %v1331_v49 = vor.u32 %v1588_v43, %v1328_v44  ;;  %v1584_v53 = vld [vmem:[#allocation6 + $0x54] sm:$0xf]  ;;  %v1304_v57 = vld [vmem:[#allocation6 + $0x48] sm:$0xf0]  ;;  %v1296_v60 = vld [vmem:[#allocation6 + $0x38] sm:$0xf0] }
  0x3e   :  { %v1315_v55 = vor.u32 %v1584_v53, %v1312_v54  ;;  %v1307_v58 = vor.u32 %v1582_v56, %v1304_v57  ;;  %v1580_v59 = vld [vmem:[#allocation6 + $0x34] sm:$0xf]  ;;  %v1286_v62 = vld [vmem:[#allocation6 + $0x20] sm:$0xf]  ;;  %v1390_v7 = vld [vmem:[#allocation6 + $0xf0] sm:$0xf] }
  0x3f   :  { %v1299_v61 = vor.u32 %v1580_v59, %v1296_v60  ;;  %v1576_v4 = vld [vmem:[#allocation6 + $0x14] sm:$0xf]  ;;  %v1605_v9 = vld [vmem:[#allocation6 + $0xf4] sm:$0xf0]  ;;  %v1392_v13 = vld [vmem:[#allocation6 + $0xf8] sm:$0xf0] }
  0x40   :  { %480 = vmatpush.bf16.msrb.mxu0 %v1177_v63  ;;  %472 = vmatpush.bf16.msrb.mxu3 %v1073_v2  ;;  %v1579_v63 = vld [vmem:[#allocation6 + $0x24] sm:$0xf0]  ;;  %v1288_v2 = vld [vmem:[#allocation6 + $0x28] sm:$0xf0]  ;;  %v1604_v12 = vld [vmem:[#allocation6 + $0xf4] sm:$0xf] }
  0x41   :  { %493 = vmatpush.bf16.msrb.mxu1 %v1241_v0  ;;  %v1578_v0 = vld [vmem:[#allocation6 + $0x24] sm:$0xf]  ;;  %v1287_v1 = vor.u32 %v1579_v63, %v1286_v62  ;;  %v1395_v14 = vor.u32 %v1604_v12, %v1392_v13  ;;  %v1270_v15 = vld [vmem:[#allocation6] sm:$0xf]  ;;  %v1603_v21 = vld [vmem:[#allocation6 + $0xe4] sm:$0xf0] }
  0x42   :  { %v1291_v3 = vor.u32 %v1578_v0, %v1288_v2  ;;  %v1574_v17 = vld [vmem:[#allocation6 + $0x4] sm:$0xf]  ;;  %v1374_v27 = vld [vmem:[#allocation6 + $0xd0] sm:$0xf]  ;;  %v1376_v31 = vld [vmem:[#allocation6 + $0xd8] sm:$0xf0] }
  0x43   :  { %473 = vmatmul.bf16.vlgmr.msrb.gmra.mxu3 %v99_v42  ;;  %v1198_v42 = vld [vmem:[#allocation4 + $0x108] sm:$0xf0]  ;;  %v1602_v24 = vld [vmem:[#allocation6 + $0xe4] sm:$0xf]  ;;  %v1366_v33 = vld [vmem:[#allocation6 + $0xc0] sm:$0xf] }
  0x44   :  { %720 = vmatpush.bf16.msra.mxu3 %v1327_v6  ;;  %481 = vmatpush.bf16.msrb.mxu0 %v1169_v10  ;;  %v1280_v6 = vld [vmem:[#allocation6 + $0x18] sm:$0xf0]  ;;  %v1598_v35 = vld [vmem:[#allocation6 + $0xc4] sm:$0xf]  ;;  %v1358_v39 = vld [vmem:[#allocation6 + $0xb0] sm:$0xf] }
  0x45   :  { %494 = vmatpush.bf16.msrb.mxu1 %v1233_v11  ;;  %v1283_v10 = vor.u32 %v1576_v4, %v1280_v6  ;;  %v1391_v11 = vor.u32 %v1605_v9, %v1390_v7  ;;  %v1597_v40 = vld [vmem:[#allocation6 + $0xb4] sm:$0xf0]  ;;  %v1360_v43 = vld [vmem:[#allocation6 + $0xb8] sm:$0xf0]  ;;  %v1594_v50 = vld [vmem:[#allocation6 + $0xa4] sm:$0xf] }
  0x46   :  { %v1593_v56 = vld [vmem:[#allocation6 + $0x94] sm:$0xf0]  ;;  %v1592_v57 = vld [vmem:[#allocation6 + $0x94] sm:$0xf]  ;;  %v1344_v60 = vld [vmem:[#allocation6 + $0x98] sm:$0xf0] }
  0x47   :  { %733 = vmatpush.bf16.msra.mxu2 %v1391_v11  ;;  %v1347_v63 = vor.u32 %v1592_v57, %v1344_v60  ;;  %v1591_v2 = vld [vmem:[#allocation6 + $0x84] sm:$0xf0]  ;;  %v1336_v4 = vld [vmem:[#allocation6 + $0x88] sm:$0xf0]  ;;  %v1618_v57 = vld [vmem:[#allocation7 + $0x64] sm:$0xf] }
  0x48   :  { %721 = vmatpush.bf16.msra.mxu3 %v1319_v16  ;;  %482 = vmatpush.bf16.msrb.mxu0 %v1161_v19  ;;  %v1575_v16 = vld [vmem:[#allocation6 + $0x4] sm:$0xf0]  ;;  %v1272_v19 = vld [vmem:[#allocation6 + $0x8] sm:$0xf0]  ;;  %v1494_v60 = vld [vmem:[#allocation7 + $0xc0] sm:$0xf] }
  0x49   :  { %495 = vmatpush.bf16.msrb.mxu1 %v1225_v20  ;;  %1267 = vmatmul.msk.bf16.vlgmr.msrb.gmra.mxu2 %vm409_vm0, %v1829_v8  ;;  %v1201_v8 = vor.u32 %v1556_v41, %v1198_v42  ;;  %v1271_v18 = vor.u32 %v1575_v16, %v1270_v15  ;;  %v1382_v20 = vld [vmem:[#allocation6 + $0xe0] sm:$0xf]  ;;  %v1275_v22 = vor.u32 %v1574_v17, %v1272_v19  ;;  %v1596_v41 = vld [vmem:[#allocation6 + $0xb4] sm:$0xf] }
  0x4a   :  { %v1383_v23 = vor.u32 %v1603_v21, %v1382_v20  ;;  %v1359_v42 = vor.u32 %v1597_v40, %v1358_v39  ;;  %v1363_v44 = vor.u32 %v1596_v41, %v1360_v43  ;;  %v1512_v40 = vld [vmem:[#allocation7 + $0xe8] sm:$0xf0]  ;;  %v1621_v43 = vld [vmem:[#allocation7 + $0x74] sm:$0xf0] }
  0x4c   :  { %722 = vmatpush.bf16.msra.mxu3 %v1311_v25  ;;  %483 = vmatpush.bf16.msrb.mxu0 %v1153_v28  ;;  %v1384_v25 = vld [vmem:[#allocation6 + $0xe8] sm:$0xf0]  ;;  %v1601_v28 = vld [vmem:[#allocation6 + $0xd4] sm:$0xf0] }
  0x4d   :  { %496 = vmatpush.bf16.msrb.mxu1 %v1217_v29  ;;  %v1387_v26 = vor.u32 %v1602_v24, %v1384_v25  ;;  %734 = vmatpush.bf16.msra.mxu2 %v1383_v23  ;;  %v1600_v29 = vld [vmem:[#allocation6 + $0xd4] sm:$0xf]  ;;  %v1375_v30 = vor.u32 %v1601_v28, %v1374_v27 }
  0x4e   :  { %v1379_v32 = vor.u32 %v1600_v29, %v1376_v31  ;;  %v1637_v31 = vld [vmem:[#allocation7 + $0xf4] sm:$0xf0] }
  0x50   :  { %723 = vmatpush.bf16.msra.mxu3 %v1303_v34  ;;  %484 = vmatpush.bf16.msrb.mxu0 %v1145_v37  ;;  %v1599_v34 = vld [vmem:[#allocation6 + $0xc4] sm:$0xf0]  ;;  %v1368_v37 = vld [vmem:[#allocation6 + $0xc8] sm:$0xf0] }
  0x51   :  { %497 = vmatpush.bf16.msrb.mxu1 %v1209_v38  ;;  %735 = vmatpush.bf16.msra.mxu2 %v1375_v30  ;;  %v1367_v36 = vor.u32 %v1599_v34, %v1366_v33  ;;  %v1371_v38 = vor.u32 %v1598_v35, %v1368_v37  ;;  %v1518_v30 = vld [vmem:[#allocation7 + $0xf0] sm:$0xf]  ;;  %v1520_v34 = vld [vmem:[#allocation7 + $0xf8] sm:$0xf0]  ;;  %v1635_v37 = vld [vmem:[#allocation7 + $0xe4] sm:$0xf0] }
  0x52   :  { %v1519_v33 = vor.u32 %v1637_v31, %v1518_v30  ;;  %v1424_v30 = vld [vmem:[#allocation7 + $0x38] sm:$0xf0] }
  0x54   :  { %724 = vmatpush.bf16.msra.mxu3 %v1295_v45  ;;  %485 = vmatpush.bf16.msrb.mxu0 %v1137_v46  ;;  %v153_v45 = vld [vmem:[#allocation9] ss:$8 sm:$0x3] }
  0x55   :  { %498 = vmatpush.bf16.msrb.mxu1 %v1201_v8  ;;  %736 = vmatpush.bf16.msra.mxu2 %v1367_v36  ;;  %v1350_v8 = vld [vmem:[#allocation6 + $0xa0] sm:$0xf]  ;;  %v155_v53 = vperm.slane %v153_v45, 0  ;;  %v156_v16 = vperm.slane %v153_v45, 1 }
  0x56   :  { %v1510_v36 = vld [vmem:[#allocation7 + $0xe0] sm:$0xf] }
  0x57   :  { %486 = vmatmul.bf16.vlgmr.msrb.gmra.mxu0 %v1835_v48  ;;  %v1577_v48 = vld [vmem:[#allocation6 + $0x14] sm:$0xf0]  ;;  %v1511_v39 = vor.u32 %v1635_v37, %v1510_v36  ;;  %v1472_v36 = vld [vmem:[#allocation7 + $0x98] sm:$0xf0] }
  0x58   :  { %746 = vmatpush.bf16.msra.mxu0 %v1331_v49  ;;  %499 = vmatmul.bf16.vlgmr.msrb.gmra.mxu1 %v1833_v47  ;;  %v1278_v47 = vld [vmem:[#allocation6 + $0x10] sm:$0xf]  ;;  %v1595_v49 = vld [vmem:[#allocation6 + $0xa4] sm:$0xf0] }
  0x59   :  { %725 = vmatpush.bf16.msra.mxu3 %v1287_v1  ;;  %v1279_v5 = vor.u32 %v1577_v48, %v1278_v47  ;;  %759 = vmatpush.bf16.msra.mxu1 %v1395_v14  ;;  %v1351_v51 = vor.u32 %v1595_v49, %v1350_v8  ;;  %v1334_v1 = vld [vmem:[#allocation6 + $0x80] sm:$0xf]  ;;  %v1502_v49 = vld [vmem:[#allocation7 + $0xd0] sm:$0xf] }
  0x5a   :  { %737 = vmatpush.bf16.msra.mxu2 %v1359_v42  ;;  %v1335_v48 = vor.u32 %v1591_v2, %v1334_v1  ;;  %v1454_v42 = vld [vmem:[#allocation7 + $0x70] sm:$0xf]  ;;  %v1496_v1 = vld [vmem:[#allocation7 + $0xc8] sm:$0xf0] }
  0x5b   :  { %v1455_v45 = vor.u32 %v1621_v43, %v1454_v42  ;;  %v1416_v42 = vld [vmem:[#allocation7 + $0x28] sm:$0xf0] }
  0x5c   :  { %747 = vmatpush.bf16.msra.mxu0 %v1323_v52  ;;  %v1352_v52 = vld [vmem:[#allocation6 + $0xa8] sm:$0xf0] }
  0x5d   :  { %726 = vmatpush.bf16.msra.mxu3 %v1279_v5  ;;  %760 = vmatpush.bf16.msra.mxu1 %v1387_v26  ;;  %v1355_v54 = vor.u32 %v1594_v50, %v1352_v52  ;;  %v1633_v50 = vld [vmem:[#allocation7 + $0xd4] sm:$0xf0] }
  0x5e   :  { %738 = vmatpush.bf16.msra.mxu2 %v1351_v51  ;;  %v1632_v51 = vld [vmem:[#allocation7 + $0xd4] sm:$0xf]  ;;  %v1503_v52 = vor.u32 %v1633_v50, %v1502_v49  ;;  %v1464_v49 = vld [vmem:[#allocation7 + $0x88] sm:$0xf0] }
  0x60   :  { %748 = vmatpush.bf16.msra.mxu0 %v1315_v55  ;;  %v1342_v55 = vld [vmem:[#allocation6 + $0x90] sm:$0xf] }
  0x61   :  { %727 = vmatpush.bf16.msra.mxu3 %v1271_v18  ;;  %761 = vmatpush.bf16.msra.mxu1 %v1379_v32  ;;  %v1343_v59 = vor.u32 %v1593_v56, %v1342_v55  ;;  %v1636_v32 = vld [vmem:[#allocation7 + $0xf4] sm:$0xf]  ;;  %v1446_v55 = vld [vmem:[#allocation7 + $0x60] sm:$0xf]  ;;  %v1619_v56 = vld [vmem:[#allocation7 + $0x64] sm:$0xf0] }
  0x62   :  { %v1523_v35 = vor.u32 %v1636_v32, %v1520_v34  ;;  %v1470_v32 = vld [vmem:[#allocation7 + $0x90] sm:$0xf]  ;;  %v1624_v34 = vld [vmem:[#allocation7 + $0x94] sm:$0xf] }
  0x63   :  { %739 = vmatpush.bf16.msra.mxu2 %v1343_v59  ;;  %v1448_v59 = vld [vmem:[#allocation7 + $0x68] sm:$0xf0]  ;;  %v1475_v37 = vor.u32 %v1624_v34, %v1472_v36 }
  0x64   :  { %749 = vmatpush.bf16.msra.mxu0 %v1307_v58 }
  0x65   :  { %762 = vmatpush.bf16.msra.mxu1 %v1371_v38  ;;  %v1634_v38 = vld [vmem:[#allocation7 + $0xe4] sm:$0xf]  ;;  %975 = vmatpush.bf16.msrb.mxu3 %v1455_v45  ;;  %v1623_v45 = vld [vmem:[#allocation7 + $0x84] sm:$0xf0] }
  0x66   :  { %v1515_v41 = vor.u32 %v1634_v38, %v1512_v40  ;;  %v1414_v38 = vld [vmem:[#allocation7 + $0x20] sm:$0xf]  ;;  %v1610_v40 = vld [vmem:[#allocation7 + $0x24] sm:$0xf] }
  0x67   :  { %740 = vmatpush.bf16.msra.mxu2 %v1335_v48  ;;  %v1616_v48 = vld [vmem:[#allocation7 + $0x54] sm:$0xf]  ;;  %v1419_v43 = vor.u32 %v1610_v40, %v1416_v42 }
  0x68   :  { %750 = vmatpush.bf16.msra.mxu0 %v1299_v61 }
  0x69   :  { %763 = vmatpush.bf16.msra.mxu1 %v1363_v44  ;;  %v1620_v44 = vld [vmem:[#allocation7 + $0x74] sm:$0xf] }
  0x6b   :  { %988 = vmatpush.bf16.msrb.mxu2 %v1519_v33  ;;  %v1625_v33 = vld [vmem:[#allocation7 + $0x94] sm:$0xf0] }
  0x6c   :  { %751 = vmatpush.bf16.msra.mxu0 %v1291_v3  ;;  %v1590_v3 = vld [vmem:[#allocation6 + $0x84] sm:$0xf] }
  0x6d   :  { %764 = vmatpush.bf16.msra.mxu1 %v1355_v54  ;;  %v1339_v5 = vor.u32 %v1590_v3, %v1336_v4  ;;  %v1438_v3 = vld [vmem:[#allocation7 + $0x50] sm:$0xf] }
  0x6f   :  { %989 = vmatpush.bf16.msrb.mxu2 %v1511_v39  ;;  %v1611_v39 = vld [vmem:[#allocation7 + $0x24] sm:$0xf0] }
  0x70   :  { %752 = vmatpush.bf16.msra.mxu0 %v1283_v10 }
  0x71   :  { %765 = vmatpush.bf16.msra.mxu1 %v1347_v63 }
  0x73   :  { %990 = vmatpush.bf16.msrb.mxu2 %v1503_v52  ;;  %v1609_v52 = vld [vmem:[#allocation7 + $0x14] sm:$0xf0] }
  0x74   :  { %753 = vmatpush.bf16.msra.mxu0 %v1275_v22 }
  0x75   :  { %766 = vmatpush.bf16.msra.mxu1 %v1339_v5  ;;  %v1440_v5 = vld [vmem:[#allocation7 + $0x58] sm:$0xf0] }
  0x79   :  { %1014 = vmatpush.bf16.msrb.mxu1 %v1523_v35  ;;  %v1471_v35 = vor.u32 %v1625_v33, %v1470_v32 }
  0x7d   :  { %1015 = vmatpush.bf16.msrb.mxu1 %v1515_v41  ;;  %v1415_v41 = vor.u32 %v1611_v39, %v1414_v38 }
  0xaa   :  { %v461_v46 = vpop.f32.mrf.mxu3 }
  0xb2   :  { %v463_v0 = vpop.f32.mrf.mxu3 }
  0xb3   :  { %v1630_v0 = vld [vmem:[#allocation7 + $0xc4] sm:$0xf] }
  0xb4   :  { %v422_v58 = vpop.f32.mrf.mxu0  ;;  %v1499_v2 = vor.u32 %v1630_v0, %v1496_v1 }
  0xb5   :  { %v423_v61 = vadd.f32 %v422_v58, %v155_v53  ;;  %v1504_v53 = vld [vmem:[#allocation7 + $0xd8] sm:$0xf0]  ;;  %v1447_v58 = vor.u32 %v1619_v56, %v1446_v55 }
  0xb6   :  { %v1507_v54 = vor.u32 %v1632_v51, %v1504_v53  ;;  %v1406_v51 = vld [vmem:[#allocation7 + $0x10] sm:$0xf]  ;;  %v1608_v53 = vld [vmem:[#allocation7 + $0x14] sm:$0xf]  ;;  %v1408_v55 = vld [vmem:[#allocation7 + $0x18] sm:$0xf0] }
  0xb7   :  { %v435_v62 = vpop.f32.mrf.mxu1  ;;  %976 = vmatpush.bf16.msrb.mxu3 %v1447_v58  ;;  %v1411_v56 = vor.u32 %v1608_v53, %v1408_v55  ;;  %v1398_v58 = vld [vmem:[#allocation7] sm:$0xf] }
  0xb8   :  { %v436_v47 = vadd.f32 %v435_v62, %v423_v61  ;;  %v1631_v61 = vld [vmem:[#allocation7 + $0xc4] sm:$0xf0]  ;;  %1016 = vmatpush.bf16.msrb.mxu1 %v1507_v54  ;;  %v1451_v62 = vor.u32 %v1618_v57, %v1448_v59  ;;  %v1407_v54 = vor.u32 %v1609_v52, %v1406_v51 }
  0xb9   :  { %v1495_v63 = vor.u32 %v1631_v61, %v1494_v60  ;;  %v1607_v59 = vld [vmem:[#allocation7 + $0x4] sm:$0xf0]  ;;  %v1606_v60 = vld [vmem:[#allocation7 + $0x4] sm:$0xf] }
  0xba   :  { %v1399_v61 = vor.u32 %v1607_v59, %v1398_v58 }
  0xbb   :  { %991 = vmatpush.bf16.msrb.mxu2 %v1495_v63 }
  0xbc   :  { %v448_v6 = vpop.f32.mrf.mxu2  ;;  %v424_v9 = vpop.f32.mrf.mxu0  ;;  %1017 = vmatpush.bf16.msrb.mxu1 %v1499_v2 }
  0xbd   :  { %v449_v7 = vadd.f32 %v448_v6, %v436_v47  ;;  %v1617_v47 = vld [vmem:[#allocation7 + $0x54] sm:$0xf0]  ;;  %v1443_v6 = vor.u32 %v1616_v48, %v1440_v5 }
  0xbe   :  { %v1439_v4 = vor.u32 %v1617_v47, %v1438_v3  ;;  %v1629_v9 = vld [vmem:[#allocation7 + $0xb4] sm:$0xf0]  ;;  %v554_v3 = vld [vmem:[#allocation9 + $0x1] ss:$8 sm:$0x3] }
  0xbf   :  { %v437_v10 = vpop.f32.mrf.mxu1  ;;  %v462_v11 = vadd.f32 %v461_v46, %v449_v7  ;;  %v1456_v46 = vld [vmem:[#allocation7 + $0x78] sm:$0xf0]  ;;  %v1486_v7 = vld [vmem:[#allocation7 + $0xb0] sm:$0xf]  ;;  %v557_v47 = vperm.slane %v554_v3, 1  ;;  %v556_v5 = vperm.slane %v554_v3, 0 }
  0xc0   :  { %v1459_v8 = vor.u32 %v1620_v44, %v1456_v46  ;;  %v1628_v10 = vld [vmem:[#allocation7 + $0xb4] sm:$0xf]  ;;  %977 = vmatpush.bf16.msrb.mxu3 %v1439_v4  ;;  %v1462_v44 = vld [vmem:[#allocation7 + $0x80] sm:$0xf]  ;;  %v1622_v46 = vld [vmem:[#allocation7 + $0x84] sm:$0xf] }
  0xc1   :  { %v517_v12 = vmax.f32 %v462_v11, 0.0  ;;  %v1487_v11 = vor.u32 %v1629_v9, %v1486_v7  ;;  %v1467_v50 = vor.u32 %v1622_v46, %v1464_v49 }
  0xc2   :  { %1001 = vmatpush.bf16.msrb.mxu0 %v1459_v8  ;;  %v1463_v8 = vor.u32 %v1623_v45, %v1462_v44 }
  0xc3   :  { %v519_v13 = vpack.c.bf16 %v517_v12, %v517_v12  ;;  %v1488_v12 = vld [vmem:[#allocation7 + $0xb8] sm:$0xf0]  ;;  %992 = vmatpush.bf16.msrb.mxu2 %v1487_v11 }
  0xc4   :  { %v450_v14 = vpop.f32.mrf.mxu2 }
  0xc5   :  { %728 = vmatmul.bf16.vlgmr.msra.gmra.mxu3 %v519_v13  ;;  %754 = vmatmul.bf16.vlgmr.msra.gmra.mxu0 %v519_v13  ;;  %v1430_v13 = vld [vmem:[#allocation7 + $0x40] sm:$0xf]  ;;  %v1615_v14 = vld [vmem:[#allocation7 + $0x44] sm:$0xf0] }
  0xc6   :  { %v474_v15 = vpop.f32.mrf.mxu3  ;;  %1002 = vmatpush.bf16.msrb.mxu0 %v1451_v62  ;;  %v1400_v62 = vld [vmem:[#allocation7 + $0x8] sm:$0xf0] }
  0xc7   :  { %v475_v19 = vadd.f32 %v474_v15, %v156_v16  ;;  %v1491_v15 = vor.u32 %v1628_v10, %v1488_v12  ;;  %v1431_v16 = vor.u32 %v1615_v14, %v1430_v13  ;;  %v1403_v63 = vor.u32 %v1606_v60, %v1400_v62 }
  0xc9   :  { %1018 = vmatpush.bf16.msrb.mxu1 %v1491_v15  ;;  %978 = vmatpush.bf16.msrb.mxu3 %v1431_v16 }
  0xca   :  { %1003 = vmatpush.bf16.msrb.mxu0 %v1443_v6 }
  0xcc   :  { %v513_v17 = vpop.f32.mrf.mxu2 }
  0xce   :  { %v476_v18 = vpop.f32.mrf.mxu3 }
  0xcf   :  { %v1432_v18 = vld [vmem:[#allocation7 + $0x48] sm:$0xf0] }
  0xd4   :  { %v487_v20 = vpop.f32.mrf.mxu0  ;;  %v515_v23 = vpop.f32.mrf.mxu2 }
  0xd5   :  { %v500_v21 = vpop.f32.mrf.mxu1  ;;  %v488_v22 = vadd.f32 %v487_v20, %v475_v19  ;;  %v1478_v19 = vld [vmem:[#allocation7 + $0xa0] sm:$0xf]  ;;  %v1480_v23 = vld [vmem:[#allocation7 + $0xa8] sm:$0xf0] }
  0xd7   :  { %v501_v24 = vadd.f32 %v500_v21, %v488_v22  ;;  %v1627_v21 = vld [vmem:[#allocation7 + $0xa4] sm:$0xf0]  ;;  %v1626_v22 = vld [vmem:[#allocation7 + $0xa4] sm:$0xf] }
  0xd9   :  { %v514_v25 = vadd.f32 %v513_v17, %v501_v24  ;;  %v1614_v17 = vld [vmem:[#allocation7 + $0x44] sm:$0xf]  ;;  %v1479_v24 = vor.u32 %v1627_v21, %v1478_v19 }
  0xda   :  { %v1435_v20 = vor.u32 %v1614_v17, %v1432_v18  ;;  %v809_v18 = vld [vmem:[#allocation9 + $0x2] ss:$8 sm:$0x3] }
  0xdb   :  { %v518_v26 = vmax.f32 %v514_v25, 0.0  ;;  %v1483_v25 = vor.u32 %v1626_v22, %v1480_v23  ;;  %993 = vmatpush.bf16.msrb.mxu2 %v1479_v24  ;;  %v812_v19 = vperm.slane %v809_v18, 1  ;;  %v1027_v22 = vlaneseq }
  0xdc   :  { %v489_v27 = vpop.f32.mrf.mxu0  ;;  %1004 = vmatpush.bf16.msrb.mxu0 %v1435_v20 }
  0xdd   :  { %v502_v28 = vpop.f32.mrf.mxu1  ;;  %v520_v29 = vpack.c.bf16 %v518_v26, %v518_v26  ;;  %v1422_v26 = vld [vmem:[#allocation7 + $0x30] sm:$0xf]  ;;  %v1613_v27 = vld [vmem:[#allocation7 + $0x34] sm:$0xf0]  ;;  %1019 = vmatpush.bf16.msrb.mxu1 %v1483_v25 }
  0xde   :  { %v1612_v28 = vld [vmem:[#allocation7 + $0x34] sm:$0xf] }
  0xdf   :  { %741 = vmatmul.bf16.vlgmr.msra.gmra.mxu2 %v520_v29  ;;  %767 = vmatmul.bf16.vlgmr.msra.gmra.mxu1 %v520_v29  ;;  %v1423_v29 = vor.u32 %v1613_v27, %v1422_v26  ;;  %v1427_v31 = vor.u32 %v1612_v28, %v1424_v30  ;;  %v811_v26 = vperm.slane %v809_v18, 0  ;;  %v1028_v27 = vand.u32 127, %v1027_v22 }
  0xe0   :  { %994 = vmatpush.bf16.msrb.mxu2 %v1471_v35 }
  0xe1   :  { %979 = vmatpush.bf16.msrb.mxu3 %v1423_v29  ;;  %1005 = vmatpush.bf16.msrb.mxu0 %v1427_v31  ;;  %vm1029_vm1 = vcmp.lt.s32.totalorder %v1028_v27, 10 }
  0xe2   :  { %1020 = vmatpush.bf16.msrb.mxu1 %v1475_v37 }
  0xe4   :  { %995 = vmatpush.bf16.msrb.mxu2 %v1463_v8 }
  0xe5   :  { %980 = vmatpush.bf16.msrb.mxu3 %v1415_v41  ;;  %1006 = vmatpush.bf16.msrb.mxu0 %v1419_v43 }
  0xe6   :  { %1021 = vmatpush.bf16.msrb.mxu1 %v1467_v50 }
  0xe9   :  { %981 = vmatpush.bf16.msrb.mxu3 %v1407_v54  ;;  %1007 = vmatpush.bf16.msrb.mxu0 %v1411_v56 }
  0xed   :  { %982 = vmatpush.bf16.msrb.mxu3 %v1399_v61  ;;  %1008 = vmatpush.bf16.msrb.mxu0 %v1403_v63 }
 0x142   :  { %v755_v57 = vpop.f32.mrf.mxu0 }
 0x143   :  { %v756_v48 = vadd.f32 %v755_v57, %v557_v47 }
 0x148   :  { %v729_v0 = vpop.f32.mrf.mxu3 }
 0x149   :  { %v730_v9 = vadd.f32 %v729_v0, %v556_v5 }
 0x14a   :  { %v757_v1 = vpop.f32.mrf.mxu0 }
 0x150   :  { %v731_v2 = vpop.f32.mrf.mxu3 }
 0x15c   :  { %v768_v4 = vpop.f32.mrf.mxu1 }
 0x15d   :  { %v769_v6 = vadd.f32 %v768_v4, %v756_v48 }
 0x15f   :  { %v773_v7 = vmax.f32 %v769_v6, 0.0 }
 0x161   :  { %v775_v10 = vpack.c.bf16 %v773_v7, %v773_v7 }
 0x162   :  { %v742_v11 = vpop.f32.mrf.mxu2 }
 0x163   :  { %v743_v12 = vadd.f32 %v742_v11, %v730_v9  ;;  %996 = vmatmul.bf16.vlgmr.msrb.gmra.mxu2 %v775_v10  ;;  %1022 = vmatmul.bf16.vlgmr.msrb.gmra.mxu1 %v775_v10 }
 0x164   :  { %v770_v13 = vpop.f32.mrf.mxu1 }
 0x165   :  { %v772_v14 = vmax.f32 %v743_v12, 0.0 }
 0x167   :  { %v774_v15 = vpack.c.bf16 %v772_v14, %v772_v14 }
 0x169   :  { %983 = vmatmul.bf16.vlgmr.msrb.gmra.mxu3 %v774_v15  ;;  %1009 = vmatmul.bf16.vlgmr.msrb.gmra.mxu0 %v774_v15 }
 0x16a   :  { %v744_v16 = vpop.f32.mrf.mxu2 }
 0x1e0   :  { %v1023_v17 = vpop.f32.mrf.mxu1 }
 0x1e6   :  { %v997_v20 = vpop.f32.mrf.mxu2  ;;  %v1010_v21 = vpop.f32.mrf.mxu0 }
 0x1e7   :  { %v1011_v23 = vadd.f32 %v1010_v21, %v812_v19 }
 0x1e8   :  { %v1025_v24 = vpop.f32.mrf.mxu1 }
 0x1e9   :  { %v1024_v25 = vadd.f32 %v1023_v17, %v1011_v23 }
 0x1eb   :  { %v1056_v28 = vmul.f32 1.442695, %v1024_v25 }
 0x1ec   :  { %v984_v29 = vpop.f32.mrf.mxu3 }
 0x1ed   :  { %1645 = vpow2.f32 %v1056_v28  ;;  %v985_v30 = vadd.f32 %v984_v29, %v811_v26 }
 0x1ee   :  { %v999_v31 = vpop.f32.mrf.mxu2  ;;  %v1012_v32 = vpop.f32.mrf.mxu0 }
 0x1ef   :  { %v998_v33 = vadd.f32 %v997_v20, %v985_v30 }
 0x1f1   :  { %v1030_v34 = vsel %vm1029_vm1, %v998_v33, -inf }
 0x1f2   :  { %1031 = vmax.xlane.f32.xlu0 %v1030_v34 }
 0x1f3   :  { %v1646_v35 = vpop.eup %1645 }
 0x1f4   :  { %1058 = vst [vmem:[%s1856_s5 + $0x8] sm:$0xff] %v1646_v35  ;;  %v986_v36 = vpop.f32.mrf.mxu3 }
 0x265   :  { %v1032_v37 = vpop.xlane.xlu0 %1031 }
 0x266   :  { %v1033_v38 = vsub.f32 %v1030_v34, %v1032_v37 }
 0x268   :  { %v1034_v39 = vmul.f32 1.442695, %v1033_v38 }
 0x26a   :  { %1647 = vpow2.f32 %v1034_v39 }
 0x270   :  { %v1648_v40 = vpop.eup %1647 }
 0x271   :  { %1036 = vadd.xlane.f32.xlu0 %v1648_v40 }
 0x2e4   :  { %v1037_v41 = vpop.xlane.xlu0 %1036 }
 0x2e5   :  { %1649 = vrcp.f32 %v1037_v41  ;;  %v1049_v45 = vand.u32 2147483648, %v1037_v41  ;;  %v1047_v8 = vand.u32 2147483647, %v1037_v41  ;;  %vm1043_vm3 = vweird.f32 %v1037_v41 }
 0x2e7   :  { %v1050_v50 = vor.u32 1.1754944e-38, %v1049_v45  ;;  %vm1048_vm5 = vcmp.eq.f32.partialorder %v1047_v8, 8.507059e+37 }
 0x2eb   :  { %v1650_v42 = vpop.eup %1649 }
 0x2ec   :  { %v1039_v43 = vmul.f32 %v1650_v42, %v1037_v41  ;;  %vm1044_vm2 = vweird.f32 %v1650_v42 }
 0x2ed   :  { %vm1045_vm4 = vmor %vm1043_vm3, %vm1044_vm2 }
 0x2ee   :  { %v1040_v44 = vsub.f32 1.0, %v1039_v43 }
 0x2f0   :  { %v1041_v46 = vmul.f32 %v1650_v42, %v1040_v44 }
 0x2f2   :  { %v1042_v49 = vadd.f32 %v1650_v42, %v1041_v46 }
 0x2f4   :  { %v1046_v51 = vsel %vm1045_vm4, %v1650_v42, %v1042_v49 }
 0x2f5   :  { %v1051_v52 = vsel %vm1048_vm5, %v1050_v50, %v1046_v51 }
 0x2f6   :  { %v1053_v53 = vmul.f32 %v1648_v40, %v1051_v52 }
 0x2f8   :  { %v1054_v54 = vsel %vm1029_vm1, %v1053_v53, %v998_v33 }
 0x2f9   :  { %1055 = vst [vmem:[%s1856_s5] sm:$0xff] %v1054_v54 }
 0x2fa   :  { %1063 = vsyncpa [#allocation3], 1 }
 0x2fb   :  { %1064 = vsyncpa [#allocation5], 1 }
 0x2fc   :  { %1065 = vsyncpa [#allocation8], 1 }

</bundles_post_ra>
